<compile_context>
chip_gen: v5e
topology: v5e:2x2
jax: 0.10.0
libtpu: 0.0.40
codegen_flags: <defaults>
</compile_context>

<pallas_src>
import functools

import jax
import jax.numpy as jnp
from jax import lax
from jax.experimental import pallas as pl
from jax.experimental.pallas import tpu as pltpu


def _round_up(x, m):
    return ((x + m - 1) // m) * m


def _synthesis_kernel(w_ref, b_ref, x_ref, o_ref, *, num_pred, feat,
                      strip, n_full, tail, flat):
    """w_ref: SMEM (P,) f32; b_ref: SMEM (1,) f32;
       x_ref: VMEM (tb, P*feat) if flat else (tb, P, feat); o_ref: VMEM (tb, feat)."""
    bias = b_ref[0]

    def load_slice(row, size, j):
        if flat:
            blk = x_ref[pl.ds(row, size), pl.ds(j * feat, feat)]
        else:
            blk = x_ref[pl.ds(row, size), j, :]
        return blk.astype(jnp.float32)

    def do_strip(row, size):
        # f32 accumulator for `size` rows: small enough to stay in vregs.
        acc = load_slice(row, size, 0) * w_ref[0]
        for j in range(1, num_pred):
            acc = acc + load_slice(row, size, j) * w_ref[j]
        o_ref[pl.ds(row, size), :] = (acc + bias).astype(o_ref.dtype)

    if n_full == 1:
        do_strip(0, strip)
    elif n_full > 1:
        def body(s, carry):
            do_strip(pl.multiple_of(s * strip, strip), strip)
            return carry
        lax.fori_loop(0, n_full, body, 0)

    if tail:
        # Static-size remainder strip (only when tb is not a strip multiple).
        do_strip(n_full * strip, tail)


def prediction_synthesis(predictions, weights, bias, *,
                         target_block_bytes=8 * 1024 * 1024):
    """predictions: (B, P, D); weights: (P,); bias: (1,) -> (B, D)."""
    B, P, D = predictions.shape
    itemsize = jnp.dtype(predictions.dtype).itemsize

    w = weights.astype(jnp.float32).reshape(P)
    b = bias.astype(jnp.float32).reshape(1)

    # Lane-dense fast path needs per-prediction feature slices that are
    # 128-lane aligned; otherwise keep the 3-D layout (full-extent last dims
    # keep the BlockSpec legal for any D).
    flat = (D % 128 == 0)

    # ---- batch tile selection -------------------------------------------
    align = 8 * max(1, 4 // itemsize)            # 8 rows f32, 16 bf16, 32 int8
    row_bytes = P * D * itemsize
    tb_bytes = max(align, (target_block_bytes // max(row_bytes, 1)) // align * align)
    # Keep >= ~8 grid steps when the batch allows it (pipelining + megacore),
    # but never shrink blocks below ~64 rows just to add steps.
    tb_split = _round_up(max(1, -(-B // 8)), align)
    tb = min(tb_bytes, max(tb_split, min(64, tb_bytes)))
    if tb >= B:
        tb = B                                   # single full-batch block (legal: full dim)
    grid = (pl.cdiv(B, tb),)                     # ragged final block masked by Pallas

    # ---- in-kernel strip size (f32 accumulator stays in vregs) -----------
    strip_nominal = max(8, min(256, (8192 // max(D, 1)) // 8 * 8))
    strip = max(1, min(strip_nominal, tb))
    n_full, tail = tb // strip, tb % strip

    # ---- VMEM budget: 2 x (input block + output block) + headroom --------
    in_block = tb * P * D * itemsize
    out_block = tb * D * itemsize
    vmem_limit = int(min(48 * 2**20,
                         max(32 * 2**20, 2 * (in_block + out_block) + (8 << 20))))

    if flat:
        x = predictions.reshape(B, P * D)        # free row-major collapse
        x_spec = pl.BlockSpec((tb, P * D), lambda i: (i, 0))
    else:
        x = predictions
        x_spec = pl.BlockSpec((tb, P, D), lambda i: (i, 0, 0))

    kernel = functools.partial(
        _synthesis_kernel, num_pred=P, feat=D,
        strip=strip, n_full=n_full, tail=tail, flat=flat)

    return pl.pallas_call(
        kernel,
        out_shape=jax.ShapeDtypeStruct((B, D), predictions.dtype),
        grid=grid,
        in_specs=[
            pl.BlockSpec(memory_space=pltpu.MemorySpace.SMEM),   # weights (P,)
            pl.BlockSpec(memory_space=pltpu.MemorySpace.SMEM),   # bias (1,)
            x_spec,                                              # predictions
        ],
        out_specs=pl.BlockSpec((tb, D), lambda i: (i, 0)),
        compiler_params=pltpu.CompilerParams(
            dimension_semantics=("parallel",),
            vmem_limit_bytes=vmem_limit,
        ),
    )(w, b, x)


def _reference(predictions, weights, bias):
    acc = jnp.sum(predictions.astype(jnp.float32)
                  * weights.astype(jnp.float32)[None, :, None], axis=1)
    return (acc + bias.astype(jnp.float32)).astype(predictions.dtype)


if __name__ == "__main__":
    key = jax.random.PRNGKey(0)
    kp, kw, kb, k2, k3, k4 = jax.random.split(key, 6)

    P, D = 16, 128            # num_predictions (module default), feature dim
    weights = jax.random.normal(kw, (P,), dtype=jnp.float32)
    bias = jax.random.normal(kb, (1,), dtype=jnp.float32)

    # Case 1: tiny batch -> single full-batch block.
    x1 = jax.random.normal(kp, (2, P, D), dtype=jnp.float32)
    o1 = jax.block_until_ready(prediction_synthesis(x1, weights, bias))
    assert o1.shape == (2, D)
    assert jnp.allclose(o1, _reference(x1, weights, bias), atol=1e-4, rtol=1e-5)

    # Case 2: ragged batch over a multi-step grid (tb forced small) -> masked
    # final block handled by Pallas, no wrapper-side padding.
    x2 = jax.random.normal(k2, (20, P, D), dtype=jnp.float32)
    o2 = jax.block_until_ready(
        prediction_synthesis(x2, weights, bias, target_block_bytes=8 * P * D * 4))
    assert o2.shape == (20, D)
    assert jnp.allclose(o2, _reference(x2, weights, bias), atol=1e-4, rtol=1e-5)

    # Case 3: batch large enough to exercise the in-kernel strip fori_loop,
    # the static tail strip, and a ragged final grid block.
    x3 = jax.random.normal(k3, (1030, P, D), dtype=jnp.float32)
    o3 = jax.block_until_ready(prediction_synthesis(x3, weights, bias))
    assert o3.shape == (1030, D)
    assert jnp.allclose(o3, _reference(x3, weights, bias), atol=1e-4, rtol=1e-5)

    # Case 4: D not a multiple of 128 -> 3-D fallback layout.
    x4 = jax.random.normal(k4, (16, P, 96), dtype=jnp.float32)
    o4 = jax.block_until_ready(prediction_synthesis(x4, weights, bias))
    assert o4.shape == (16, 96)
    assert jnp.allclose(o4, _reference(x4, weights, bias), atol=1e-4, rtol=1e-5)

    print("KERNEL_OK")
</pallas_src>

<mosaic_0001>
module attributes {stable_mosaic.version = 11 : i64} {
  func.func @_synthesis_kernel(%arg0: i32, %arg1: memref<16xf32, #tpu.memory_space<smem>>, %arg2: memref<1xf32, #tpu.memory_space<smem>>, %arg3: memref<2x2048xf32, #tpu.memory_space<vmem>>, %arg4: memref<2x128xf32, #tpu.memory_space<vmem>>) attributes {dimension_semantics = [#tpu.dimension_semantics<parallel>], iteration_bounds = array<i64: 1>, scalar_prefetch = 0 : i64, scratch_operands = 0 : i64, tpu.core_type = #tpu.core_type<tc>, window_params = [{transform_indices = @transform_0, window_bounds = array<i64: 16>}, {transform_indices = @transform_1, window_bounds = array<i64: 1>}, {transform_indices = @transform_2, window_bounds = array<i64: 2, 2048>}, {transform_indices = @transform_3, window_bounds = array<i64: 2, 128>}]} {
    %c0 = arith.constant 0 : index
    %0 = memref.load %arg2[%c0] : memref<1xf32, #tpu.memory_space<smem>>
    %c0_0 = arith.constant 0 : index
    %c0_1 = arith.constant 0 : index
    %1 = vector.load %arg3[%c0_0, %c0_1] : memref<2x2048xf32, #tpu.memory_space<vmem>>, vector<2x128xf32>
    %c0_2 = arith.constant 0 : index
    %2 = memref.load %arg1[%c0_2] : memref<16xf32, #tpu.memory_space<smem>>
    %3 = vector.broadcast %2 : f32 to vector<2x128xf32>
    %4 = arith.mulf %1, %3 : vector<2x128xf32>
    %c0_3 = arith.constant 0 : index
    %c128 = arith.constant 128 : index
    %5 = vector.load %arg3[%c0_3, %c128] : memref<2x2048xf32, #tpu.memory_space<vmem>>, vector<2x128xf32>
    %c1 = arith.constant 1 : index
    %6 = memref.load %arg1[%c1] : memref<16xf32, #tpu.memory_space<smem>>
    %7 = vector.broadcast %6 : f32 to vector<2x128xf32>
    %8 = arith.mulf %5, %7 : vector<2x128xf32>
    %9 = arith.addf %4, %8 : vector<2x128xf32>
    %c0_4 = arith.constant 0 : index
    %c256 = arith.constant 256 : index
    %10 = vector.load %arg3[%c0_4, %c256] : memref<2x2048xf32, #tpu.memory_space<vmem>>, vector<2x128xf32>
    %c2 = arith.constant 2 : index
    %11 = memref.load %arg1[%c2] : memref<16xf32, #tpu.memory_space<smem>>
    %12 = vector.broadcast %11 : f32 to vector<2x128xf32>
    %13 = arith.mulf %10, %12 : vector<2x128xf32>
    %14 = arith.addf %9, %13 : vector<2x128xf32>
    %c0_5 = arith.constant 0 : index
    %c384 = arith.constant 384 : index
    %15 = vector.load %arg3[%c0_5, %c384] : memref<2x2048xf32, #tpu.memory_space<vmem>>, vector<2x128xf32>
    %c3 = arith.constant 3 : index
    %16 = memref.load %arg1[%c3] : memref<16xf32, #tpu.memory_space<smem>>
    %17 = vector.broadcast %16 : f32 to vector<2x128xf32>
    %18 = arith.mulf %15, %17 : vector<2x128xf32>
    %19 = arith.addf %14, %18 : vector<2x128xf32>
    %c0_6 = arith.constant 0 : index
    %c512 = arith.constant 512 : index
    %20 = vector.load %arg3[%c0_6, %c512] : memref<2x2048xf32, #tpu.memory_space<vmem>>, vector<2x128xf32>
    %c4 = arith.constant 4 : index
    %21 = memref.load %arg1[%c4] : memref<16xf32, #tpu.memory_space<smem>>
    %22 = vector.broadcast %21 : f32 to vector<2x128xf32>
    %23 = arith.mulf %20, %22 : vector<2x128xf32>
    %24 = arith.addf %19, %23 : vector<2x128xf32>
    %c0_7 = arith.constant 0 : index
    %c640 = arith.constant 640 : index
    %25 = vector.load %arg3[%c0_7, %c640] : memref<2x2048xf32, #tpu.memory_space<vmem>>, vector<2x128xf32>
    %c5 = arith.constant 5 : index
    %26 = memref.load %arg1[%c5] : memref<16xf32, #tpu.memory_space<smem>>
    %27 = vector.broadcast %26 : f32 to vector<2x128xf32>
    %28 = arith.mulf %25, %27 : vector<2x128xf32>
    %29 = arith.addf %24, %28 : vector<2x128xf32>
    %c0_8 = arith.constant 0 : index
    %c768 = arith.constant 768 : index
    %30 = vector.load %arg3[%c0_8, %c768] : memref<2x2048xf32, #tpu.memory_space<vmem>>, vector<2x128xf32>
    %c6 = arith.constant 6 : index
    %31 = memref.load %arg1[%c6] : memref<16xf32, #tpu.memory_space<smem>>
    %32 = vector.broadcast %31 : f32 to vector<2x128xf32>
    %33 = arith.mulf %30, %32 : vector<2x128xf32>
    %34 = arith.addf %29, %33 : vector<2x128xf32>
    %c0_9 = arith.constant 0 : index
    %c896 = arith.constant 896 : index
    %35 = vector.load %arg3[%c0_9, %c896] : memref<2x2048xf32, #tpu.memory_space<vmem>>, vector<2x128xf32>
    %c7 = arith.constant 7 : index
    %36 = memref.load %arg1[%c7] : memref<16xf32, #tpu.memory_space<smem>>
    %37 = vector.broadcast %36 : f32 to vector<2x128xf32>
    %38 = arith.mulf %35, %37 : vector<2x128xf32>
    %39 = arith.addf %34, %38 : vector<2x128xf32>
    %c0_10 = arith.constant 0 : index
    %c1024 = arith.constant 1024 : index
    %40 = vector.load %arg3[%c0_10, %c1024] : memref<2x2048xf32, #tpu.memory_space<vmem>>, vector<2x128xf32>
    %c8 = arith.constant 8 : index
    %41 = memref.load %arg1[%c8] : memref<16xf32, #tpu.memory_space<smem>>
    %42 = vector.broadcast %41 : f32 to vector<2x128xf32>
    %43 = arith.mulf %40, %42 : vector<2x128xf32>
    %44 = arith.addf %39, %43 : vector<2x128xf32>
    %c0_11 = arith.constant 0 : index
    %c1152 = arith.constant 1152 : index
    %45 = vector.load %arg3[%c0_11, %c1152] : memref<2x2048xf32, #tpu.memory_space<vmem>>, vector<2x128xf32>
    %c9 = arith.constant 9 : index
    %46 = memref.load %arg1[%c9] : memref<16xf32, #tpu.memory_space<smem>>
    %47 = vector.broadcast %46 : f32 to vector<2x128xf32>
    %48 = arith.mulf %45, %47 : vector<2x128xf32>
    %49 = arith.addf %44, %48 : vector<2x128xf32>
    %c0_12 = arith.constant 0 : index
    %c1280 = arith.constant 1280 : index
    %50 = vector.load %arg3[%c0_12, %c1280] : memref<2x2048xf32, #tpu.memory_space<vmem>>, vector<2x128xf32>
    %c10 = arith.constant 10 : index
    %51 = memref.load %arg1[%c10] : memref<16xf32, #tpu.memory_space<smem>>
    %52 = vector.broadcast %51 : f32 to vector<2x128xf32>
    %53 = arith.mulf %50, %52 : vector<2x128xf32>
    %54 = arith.addf %49, %53 : vector<2x128xf32>
    %c0_13 = arith.constant 0 : index
    %c1408 = arith.constant 1408 : index
    %55 = vector.load %arg3[%c0_13, %c1408] : memref<2x2048xf32, #tpu.memory_space<vmem>>, vector<2x128xf32>
    %c11 = arith.constant 11 : index
    %56 = memref.load %arg1[%c11] : memref<16xf32, #tpu.memory_space<smem>>
    %57 = vector.broadcast %56 : f32 to vector<2x128xf32>
    %58 = arith.mulf %55, %57 : vector<2x128xf32>
    %59 = arith.addf %54, %58 : vector<2x128xf32>
    %c0_14 = arith.constant 0 : index
    %c1536 = arith.constant 1536 : index
    %60 = vector.load %arg3[%c0_14, %c1536] : memref<2x2048xf32, #tpu.memory_space<vmem>>, vector<2x128xf32>
    %c12 = arith.constant 12 : index
    %61 = memref.load %arg1[%c12] : memref<16xf32, #tpu.memory_space<smem>>
    %62 = vector.broadcast %61 : f32 to vector<2x128xf32>
    %63 = arith.mulf %60, %62 : vector<2x128xf32>
    %64 = arith.addf %59, %63 : vector<2x128xf32>
    %c0_15 = arith.constant 0 : index
    %c1664 = arith.constant 1664 : index
    %65 = vector.load %arg3[%c0_15, %c1664] : memref<2x2048xf32, #tpu.memory_space<vmem>>, vector<2x128xf32>
    %c13 = arith.constant 13 : index
    %66 = memref.load %arg1[%c13] : memref<16xf32, #tpu.memory_space<smem>>
    %67 = vector.broadcast %66 : f32 to vector<2x128xf32>
    %68 = arith.mulf %65, %67 : vector<2x128xf32>
    %69 = arith.addf %64, %68 : vector<2x128xf32>
    %c0_16 = arith.constant 0 : index
    %c1792 = arith.constant 1792 : index
    %70 = vector.load %arg3[%c0_16, %c1792] : memref<2x2048xf32, #tpu.memory_space<vmem>>, vector<2x128xf32>
    %c14 = arith.constant 14 : index
    %71 = memref.load %arg1[%c14] : memref<16xf32, #tpu.memory_space<smem>>
    %72 = vector.broadcast %71 : f32 to vector<2x128xf32>
    %73 = arith.mulf %70, %72 : vector<2x128xf32>
    %74 = arith.addf %69, %73 : vector<2x128xf32>
    %c0_17 = arith.constant 0 : index
    %c1920 = arith.constant 1920 : index
    %75 = vector.load %arg3[%c0_17, %c1920] : memref<2x2048xf32, #tpu.memory_space<vmem>>, vector<2x128xf32>
    %c15 = arith.constant 15 : index
    %76 = memref.load %arg1[%c15] : memref<16xf32, #tpu.memory_space<smem>>
    %77 = vector.broadcast %76 : f32 to vector<2x128xf32>
    %78 = arith.mulf %75, %77 : vector<2x128xf32>
    %79 = arith.addf %74, %78 : vector<2x128xf32>
    %80 = vector.broadcast %0 : f32 to vector<2x128xf32>
    %81 = arith.addf %79, %80 : vector<2x128xf32>
    %c0_18 = arith.constant 0 : index
    %c0_19 = arith.constant 0 : index
    %82 = vector.load %arg4[%c0_18, %c0_19] : memref<2x128xf32, #tpu.memory_space<vmem>>, vector<2x128xf32>
    tpu.vector_store %arg4[%c0_18, %c0_19], %81 {strides = array<i32>} : memref<2x128xf32, #tpu.memory_space<vmem>>, vector<2x128xf32>,
    return
  }
  func.func @transform_0(%arg0: i32) -> i32 {
    %c0_i32 = arith.constant 0 : i32
    %c0_i32_0 = arith.constant 0 : i32
    return %c0_i32 : i32
  }
  func.func @transform_1(%arg0: i32) -> i32 {
    %c0_i32 = arith.constant 0 : i32
    %c0_i32_0 = arith.constant 0 : i32
    return %c0_i32 : i32
  }
  func.func @transform_2(%arg0: i32) -> (i32, i32) {
    %c0_i32 = arith.constant 0 : i32
    %c0_i32_0 = arith.constant 0 : i32
    return %arg0, %c0_i32 : i32, i32
  }
  func.func @transform_3(%arg0: i32) -> (i32, i32) {
    %c0_i32 = arith.constant 0 : i32
    %c0_i32_0 = arith.constant 0 : i32
    return %arg0, %c0_i32 : i32, i32
  }
}

</mosaic_0001>

<bundles_post_ra>
// kernel: tpu_custom_call.1
= control target key start
LH: loop header
LB: loop body
LE: loop exit
PB: predicated region body
PF: predicated region fallthrough
CT: control target
= control target key end

     0   :  { %9 = vsyncpa [#allocation6], 0  ;;  %s263_s0 = inlined_call_operand.vmem [shape: f32[16], index: 0, kind: input, shape index: {}]   ;;  %s264_s1 = inlined_call_operand.<no memory space> [shape: f32[1], index: 1, kind: input, shape index: {}]   ;;  %s265_s2 = inlined_call_operand.hbm [shape: f32[2,2048], index: 2, kind: input, shape index: {}]   ;;  %s266_s3 = inlined_call_operand.hbm [shape: f32[2,128], index: 3, kind: output, shape index: {}]  }
   0x1   :  { %10 = vsyncpa [#allocation4], 0 }
   0x2   :  { %11 = vsyncpa [#allocation5], 0  ;;  %s17_s14 = sshll.u32 %s263_s0, 4  ;;  %s28_s17 = sshll.u32 %s265_s2, 4  ;;  %s18_s14 = int_to_ptr.vmem [resolvable:$true] %s17_s14  ;;  %s29_s17 = int_to_ptr.hbm [resolvable:$true] %s28_s17 }
   0x3   :  { %s228_s18 = smov [#allocation3]   ;;  %s229_s19 = smov [#allocation7]  }
   0x4   :  { %20 = dma.vmem_to_smem %s18_s14, 16, %s228_s18, [#allocation6]  }
   0x5   :  { %s30_s20 = sshll.u32 %s229_s19, 4  ;;  %s31_s20 = int_to_ptr.vmem [resolvable:$true] %s30_s20 }
   0x6   :  { %33 = dma.hbm_to_vmem [thread:$0]  %s29_s17, 512, %s31_s20, [#allocation4]  }
   0x7   :  { %222 = dma.done.wait [#allocation6], 16  }
   0x8   :  { %223 = vsyncadd [#allocation6], 4294967280 }
   0x9   :  { %224 = dma.done.wait [#allocation4], 512  }
   0xa   :  { %225 = vsyncadd [#allocation4], 4294966784 }
   0xb   :  { %42 = sfence }
   0xc   :  { %s45_s21 = sld [smem:[#allocation3]]  ;;  %v44_v0 = vld [vmem:[#allocation7] sm:$0x3]  ;;  %v48_v1 = vld [vmem:[#allocation7 + $0x2] sm:$0x3]  ;;  %v123_v62 = vstv %s264_s1  ;;  %s230_s10 = smov [#allocation8]  }
   0xd   :  { %s144_s22 = sld [smem:[#allocation3 + $0x1]]  ;;  %v53_v3 = vld [vmem:[#allocation7 + $0x4] sm:$0x3]  ;;  %v58_v6 = vld [vmem:[#allocation7 + $0x6] sm:$0x3]  ;;  %s131_s11 = sshll.u32 %s230_s10, 4  ;;  %s132_s11 = int_to_ptr.vmem [resolvable:$true] %s131_s11 }
   0xe   :  { %s145_s0 = sld [smem:[#allocation3 + $0x2]]  ;;  %v63_v11 = vld [vmem:[#allocation7 + $0x8] sm:$0x3]  ;;  %v68_v15 = vld [vmem:[#allocation7 + $0xa] sm:$0x3]  ;;  %s133_s14 = sshll.u32 %s266_s3, 4  ;;  %s134_s14 = int_to_ptr.hbm [resolvable:$true] %s133_s14 }
   0xf   :  { %s146_s23 = sld [smem:[#allocation3 + $0x3]]  ;;  %v73_v19 = vld [vmem:[#allocation7 + $0xc] sm:$0x3]  ;;  %v78_v23 = vld [vmem:[#allocation7 + $0xe] sm:$0x3] }
  0x10   :  { %s147_s24 = sld [smem:[#allocation3 + $0x4]]  ;;  %v83_v27 = vld [vmem:[#allocation7 + $0x10] sm:$0x3]  ;;  %v88_v31 = vld [vmem:[#allocation7 + $0x12] sm:$0x3] }
  0x11   :  { %s148_s2 = sld [smem:[#allocation3 + $0x5]]  ;;  %v93_v35 = vld [vmem:[#allocation7 + $0x14] sm:$0x3]  ;;  %v98_v39 = vld [vmem:[#allocation7 + $0x16] sm:$0x3] }
  0x12   :  { %v46_v2 = vstv %s45_s21  ;;  %s149_s25 = sld [smem:[#allocation3 + $0x6]]  ;;  %v103_v43 = vld [vmem:[#allocation7 + $0x18] sm:$0x3]  ;;  %v108_v47 = vld [vmem:[#allocation7 + $0x1a] sm:$0x3] }
  0x13   :  { %v47_v4 = vmul.f32 %v46_v2, %v44_v0  ;;  %v50_v5 = vstv %s144_s22  ;;  %s150_s26 = sld [smem:[#allocation3 + $0x7]]  ;;  %v113_v51 = vld [vmem:[#allocation7 + $0x1c] sm:$0x3]  ;;  %v118_v55 = vld [vmem:[#allocation7 + $0x1e] sm:$0x3] }
  0x14   :  { %v51_v7 = vmul.f32 %v50_v5, %v48_v1  ;;  %v55_v8 = vstv %s145_s0  ;;  %s151_s27 = sld [smem:[#allocation3 + $0x8]] }
  0x15   :  { %v56_v9 = vmul.f32 %v55_v8, %v53_v3  ;;  %v60_v10 = vstv %s146_s23  ;;  %s152_s28 = sld [smem:[#allocation3 + $0x9]] }
  0x16   :  { %v52_v12 = vadd.f32 %v51_v7, %v47_v4  ;;  %v61_v13 = vmul.f32 %v60_v10, %v58_v6  ;;  %v65_v14 = vstv %s147_s24  ;;  %s153_s29 = sld [smem:[#allocation3 + $0xa]] }
  0x17   :  { %v70_v16 = vstv %s148_s2  ;;  %v66_v18 = vmul.f32 %v65_v14, %v63_v11  ;;  %s154_s30 = sld [smem:[#allocation3 + $0xb]] }
  0x18   :  { %v57_v17 = vadd.f32 %v56_v9, %v52_v12  ;;  %v75_v20 = vstv %s149_s25  ;;  %v71_v22 = vmul.f32 %v70_v16, %v68_v15  ;;  %s155_s4 = sld [smem:[#allocation3 + $0xc]] }
  0x19   :  { %v80_v24 = vstv %s150_s26  ;;  %v76_v26 = vmul.f32 %v75_v20, %v73_v19  ;;  %s156_s5 = sld [smem:[#allocation3 + $0xd]] }
  0x1a   :  { %v62_v21 = vadd.f32 %v61_v13, %v57_v17  ;;  %v85_v28 = vstv %s151_s27  ;;  %v81_v30 = vmul.f32 %v80_v24, %v78_v23  ;;  %s157_s6 = sld [smem:[#allocation3 + $0xe]] }
  0x1b   :  { %v90_v32 = vstv %s152_s28  ;;  %v86_v34 = vmul.f32 %v85_v28, %v83_v27  ;;  %s158_s7 = sld [smem:[#allocation3 + $0xf]] }
  0x1c   :  { %v67_v25 = vadd.f32 %v66_v18, %v62_v21  ;;  %v95_v36 = vstv %s153_s29  ;;  %v91_v38 = vmul.f32 %v90_v32, %v88_v31 }
  0x1d   :  { %v100_v40 = vstv %s154_s30  ;;  %v96_v42 = vmul.f32 %v95_v36, %v93_v35 }
  0x1e   :  { %v72_v29 = vadd.f32 %v71_v22, %v67_v25  ;;  %v105_v44 = vstv %s155_s4  ;;  %v101_v46 = vmul.f32 %v100_v40, %v98_v39 }
  0x1f   :  { %v110_v48 = vstv %s156_s5  ;;  %v106_v50 = vmul.f32 %v105_v44, %v103_v43 }
  0x20   :  { %v77_v33 = vadd.f32 %v76_v26, %v72_v29  ;;  %v115_v52 = vstv %s157_s6  ;;  %v111_v54 = vmul.f32 %v110_v48, %v108_v47 }
  0x21   :  { %v120_v56 = vstv %s158_s7  ;;  %v116_v58 = vmul.f32 %v115_v52, %v113_v51 }
  0x22   :  { %v82_v37 = vadd.f32 %v81_v30, %v77_v33  ;;  %v121_v60 = vmul.f32 %v120_v56, %v118_v55 }
  0x24   :  { %v87_v41 = vadd.f32 %v86_v34, %v82_v37 }
  0x26   :  { %v92_v45 = vadd.f32 %v91_v38, %v87_v41 }
  0x28   :  { %v97_v49 = vadd.f32 %v96_v42, %v92_v45 }
  0x2a   :  { %v102_v53 = vadd.f32 %v101_v46, %v97_v49 }
  0x2c   :  { %v107_v57 = vadd.f32 %v106_v50, %v102_v53 }
  0x2e   :  { %v112_v59 = vadd.f32 %v111_v54, %v107_v57 }
  0x30   :  { %v117_v61 = vadd.f32 %v116_v58, %v112_v59 }
  0x32   :  { %v122_v63 = vadd.f32 %v121_v60, %v117_v61 }
  0x34   :  { %v124_v0 = vadd.f32 %v123_v62, %v122_v63 }
  0x36   :  { %125 = vst [vmem:[#allocation8] sm:$0x3] %v124_v0 }
  0x37   :  { %136 = dma.vmem_to_hbm [thread:$0]  %s132_s11, 32, %s134_s14, [#allocation5]  }
  0x38   :  { %226 = dma.done.wait [#allocation5], 32  }
  0x39   :  { %227 = vsyncadd [#allocation5], 4294967264 }
  0x3a   :  { %141 = vsyncpa [#allocation4], 1 }
  0x3b   :  { %142 = vsyncpa [#allocation5], 1 }
  0x3c   :  { %143 = vsyncpa [#allocation6], 1 }

</bundles_post_ra>
